<compile_context>
chip_gen: v7x
topology: tpu7x:2x2x1
jax: 0.10.0
libtpu: 0.0.40
codegen_flags: <defaults>
</compile_context>

<pallas_src>
import math
import functools

import jax
import jax.numpy as jnp
from jax.experimental import pallas as pl
from jax.experimental.pallas import tpu as pltpu


def _build_pe_table(d_model: int, max_len: int, dtype=jnp.float32) -> jnp.ndarray:
    """Sinusoidal PE table (max_len, d_model); mirrors the torch __init__ (even d_model)."""
    position = jnp.arange(0, max_len, dtype=jnp.float32)[:, None]            # (max_len, 1)
    div_term = jnp.exp(
        jnp.arange(0, d_model, 2, dtype=jnp.float32) * (-math.log(10000.0) / d_model)
    )                                                                         # (d_model/2,)
    angles = position * div_term                                              # (max_len, d_model/2)
    pe = jnp.zeros((max_len, d_model), dtype=jnp.float32)
    pe = pe.at[:, 0::2].set(jnp.sin(angles))
    pe = pe.at[:, 1::2].set(jnp.cos(angles))
    return pe.astype(dtype)


def _pe_add_bcast_kernel(x_ref, pe_ref, o_ref):
    # x_ref / o_ref: (tile_s, B, D); pe_ref: (tile_s, D) -> broadcast over batch.
    o_ref[...] = (x_ref[...] + pe_ref[...][:, None, :]).astype(o_ref.dtype)


def _pe_add_flat_kernel(x_ref, pe_ref, o_ref):
    # x_ref / pe_ref / o_ref: (tile_s, B*D) -- lane-dense 2-D elementwise add.
    o_ref[...] = (x_ref[...] + pe_ref[...]).astype(o_ref.dtype)


def _choose_tile_s(S: int, row_bytes: int,
                   target_block_bytes: int = 4 * 1024 * 1024,
                   min_grid_steps: int = 4) -> int:
    """Seq-tile: multiple of 8 (or == S if S <= 8), ~target bytes per x block,
    while keeping >= min_grid_steps grid steps when S is big enough (v7x 2 TCs)."""
    if S <= 8:
        return S
    tile = (target_block_bytes // max(row_bytes, 1)) // 8 * 8
    tile = max(8, tile)
    if S >= min_grid_steps * 8:
        cap = max(8, (-(-S // min_grid_steps)) // 8 * 8)   # ~S/min_grid_steps, mult of 8
        tile = min(tile, cap)
    tile = min(tile, max(8, (S // 8) * 8))
    return tile


@functools.partial(jax.jit, static_argnames=("donate_x",))
def positional_encoding_forward(x: jnp.ndarray, pe_table: jnp.ndarray,
                                donate_x: bool = False) -> jnp.ndarray:
    """x: (S, B, D); pe_table: (max_len, D). Returns x + pe[:S] broadcast over B."""
    S, B, D = x.shape
    max_len, d_pe = pe_table.shape
    assert d_pe == D and S <= max_len

    pe_table = pe_table.astype(x.dtype)          # keep the add + pe DMA in x's dtype
    itemsize = jnp.dtype(x.dtype).itemsize
    tile_s = _choose_tile_s(S, B * D * itemsize)
    grid = (pl.cdiv(S, tile_s),)

    compiler_params = pltpu.CompilerParams(
        dimension_semantics=("parallel",),
        vmem_limit_bytes=32 * 1024 * 1024,
    )
    io_alias = {0: 0} if donate_x else {}

    aligned = (D % 128 == 0) and (B % 8 == 0)
    if aligned:
        # 3-D tiles: minor dim D is a multiple of 128, second-minor B a multiple
        # of 8 -> unmasked lane/sublane-dense stores.  Full pe_table is passed
        # (no wrapper-side slice); the index_map only touches the first S rows.
        return pl.pallas_call(
            _pe_add_bcast_kernel,
            out_shape=jax.ShapeDtypeStruct((S, B, D), x.dtype),
            grid_spec=pltpu.PrefetchScalarGridSpec(
                num_scalar_prefetch=0,
                grid=grid,
                in_specs=[
                    pl.BlockSpec((tile_s, B, D), lambda i: (i, 0, 0)),
                    pl.BlockSpec((tile_s, D), lambda i: (i, 0)),
                ],
                out_specs=pl.BlockSpec((tile_s, B, D), lambda i: (i, 0, 0)),
            ),
            compiler_params=compiler_params,
            input_output_aliases=io_alias,
        )(x, pe_table)

    # Fallback for small / unaligned (B, D): flatten the minor axes so the
    # output stores are as lane-dense as the shape allows, and pre-tile pe
    # across the batch so the kernel is a plain 2-D add.
    x_flat = x.reshape(S, B * D)
    pe_flat = jnp.tile(pe_table[:S], (1, B))      # (S, B*D)
    out_flat = pl.pallas_call(
        _pe_add_flat_kernel,
        out_shape=jax.ShapeDtypeStruct((S, B * D), x.dtype),
        grid_spec=pltpu.PrefetchScalarGridSpec(
            num_scalar_prefetch=0,
            grid=grid,
            in_specs=[
                pl.BlockSpec((tile_s, B * D), lambda i: (i, 0)),
                pl.BlockSpec((tile_s, B * D), lambda i: (i, 0)),
            ],
            out_specs=pl.BlockSpec((tile_s, B * D), lambda i: (i, 0)),
        ),
        compiler_params=compiler_params,
        input_output_aliases=io_alias,
    )(x_flat, pe_flat)
    return out_flat.reshape(S, B, D)


if __name__ == "__main__":
    key = jax.random.PRNGKey(0)
    k1, k2 = jax.random.split(key)

    # Case 1: small unaligned shape (module-default style) -> flattened path.
    d_model, max_len, seq_len, batch = 32, 64, 8, 2
    pe_table = _build_pe_table(d_model, max_len)
    x = jax.random.normal(k1, (seq_len, batch, d_model), dtype=jnp.float32)
    out = jax.block_until_ready(positional_encoding_forward(x, pe_table))
    ref = x + pe_table[:seq_len, None, :]
    assert out.shape == x.shape and out.dtype == x.dtype
    assert jnp.allclose(out, ref, atol=1e-6, rtol=1e-6)

    # Case 2: lane/sublane-aligned shape -> 3-D broadcast path (still small).
    d_model2, max_len2, seq_len2, batch2 = 128, 128, 64, 8
    pe_table2 = _build_pe_table(d_model2, max_len2)
    x2 = jax.random.normal(k2, (seq_len2, batch2, d_model2), dtype=jnp.float32)
    out2 = jax.block_until_ready(positional_encoding_forward(x2, pe_table2))
    ref2 = x2 + pe_table2[:seq_len2, None, :]
    assert out2.shape == x2.shape and out2.dtype == x2.dtype
    assert jnp.allclose(out2, ref2, atol=1e-6, rtol=1e-6)

    print("KERNEL_OK")
</pallas_src>

<mosaic_0001>
module attributes {stable_mosaic.version = 11 : i64} {
  func.func @_pe_add_flat_kernel(%arg0: i32, %arg1: memref<8x64xf32, #tpu.memory_space<vmem>>, %arg2: memref<8x64xf32, #tpu.memory_space<vmem>>, %arg3: memref<8x64xf32, #tpu.memory_space<vmem>>) attributes {dimension_semantics = [#tpu.dimension_semantics<parallel>], iteration_bounds = array<i64: 1>, scalar_prefetch = 0 : i64, scratch_operands = 0 : i64, tpu.core_type = #tpu.core_type<tc>, window_params = [{transform_indices = @transform_0, window_bounds = array<i64: 8, 64>}, {transform_indices = @transform_1, window_bounds = array<i64: 8, 64>}, {transform_indices = @transform_2, window_bounds = array<i64: 8, 64>}]} {
    %c0 = arith.constant 0 : index
    %c0_0 = arith.constant 0 : index
    %0 = vector.load %arg1[%c0, %c0_0] : memref<8x64xf32, #tpu.memory_space<vmem>>, vector<8x64xf32>
    %c0_1 = arith.constant 0 : index
    %c0_2 = arith.constant 0 : index
    %1 = vector.load %arg2[%c0_1, %c0_2] : memref<8x64xf32, #tpu.memory_space<vmem>>, vector<8x64xf32>
    %2 = arith.addf %0, %1 : vector<8x64xf32>
    %c0_3 = arith.constant 0 : index
    %c0_4 = arith.constant 0 : index
    %3 = vector.load %arg3[%c0_3, %c0_4] : memref<8x64xf32, #tpu.memory_space<vmem>>, vector<8x64xf32>
    tpu.vector_store %arg3[%c0_3, %c0_4], %2 {strides = array<i32>} : memref<8x64xf32, #tpu.memory_space<vmem>>, vector<8x64xf32>,
    return
  }
  func.func @transform_0(%arg0: i32) -> (i32, i32) {
    %c0_i32 = arith.constant 0 : i32
    %c0_i32_0 = arith.constant 0 : i32
    return %arg0, %c0_i32 : i32, i32
  }
  func.func @transform_1(%arg0: i32) -> (i32, i32) {
    %c0_i32 = arith.constant 0 : i32
    %c0_i32_0 = arith.constant 0 : i32
    return %arg0, %c0_i32 : i32, i32
  }
  func.func @transform_2(%arg0: i32) -> (i32, i32) {
    %c0_i32 = arith.constant 0 : i32
    %c0_i32_0 = arith.constant 0 : i32
    return %arg0, %c0_i32 : i32, i32
  }
}

</mosaic_0001>

<bundles_post_ra>
// kernel: tile.9
= control target key start
LH: loop header
LB: loop body
LE: loop exit
PB: predicated region body
PF: predicated region fallthrough
CT: control target
= control target key end

     0   :  { %vm42_vm0 = vcmask 1047556   ;;  %vm44_vm1 = vcmask 261120   ;;  %vm54_vm2 = vcmask 523520   ;;  %s111_s0 = inlined_call_operand.vmem [shape: f32[8,2,32], index: 0, kind: input, shape index: {}]   ;;  %s112_s1 = inlined_call_operand.vmem [shape: f32[8,64], index: 1, kind: output, shape index: {}]  }
   0x1   :  { %v62_v0 = vld [vmem:[%s111_s0 + $0xe] sm:$0x3]  ;;  %v63_v1 = vld [vmem:[%s111_s0 + $0xc] sm:$0x3]  ;;  %v64_v2 = vld [vmem:[%s111_s0 + $0xa] sm:$0x3] }
   0x2   :  { %8 = vst [vmem:[#allocation0 + $0x38] sm:$0x3] %v62_v0  ;;  %13 = vst [vmem:[#allocation0 + $0x30] sm:$0x3] %v63_v1  ;;  %v65_v3 = vld [vmem:[%s111_s0 + $0x8] sm:$0x3] }
   0x3   :  { %18 = vst [vmem:[#allocation0 + $0x28] sm:$0x3] %v64_v2  ;;  %v66_v4 = vld [vmem:[%s111_s0 + $0x6] sm:$0x3]  ;;  %v67_v5 = vld [vmem:[%s111_s0 + $0x4] sm:$0x3] }
   0x4   :  { %23 = vst [vmem:[#allocation0 + $0x20] sm:$0x3] %v65_v3  ;;  %28 = vst [vmem:[#allocation0 + $0x18] sm:$0x3] %v66_v4  ;;  %v68_v6 = vld [vmem:[%s111_s0 + $0x2] sm:$0x3] }
   0x5   :  { %33 = vst [vmem:[#allocation0 + $0x10] sm:$0x3] %v67_v5  ;;  %v38_v7 = vld [vmem:[%s111_s0] sm:$0x3]  ;;  %37 = vst [vmem:[#allocation0 + $0x8] sm:$0x3] %v68_v6 }
   0x6   :  { %39 = vst [vmem:[#allocation0] sm:$0x3] %v38_v7  ;;  %s70_s0 = smov 32  }
   0xb   :  { %v41_v8 = vld [vmem:[#allocation0] ss:$8 sm:$0xf0]   ;;  %v49_v9 = vld [vmem:[#allocation0 + $0x1] ss:$8 sm:$0xf0]  }
   0xd   :  { %v40_v10 = vld [vmem:[#allocation0] ss:$8 sm:$0xf]   ;;  %v47_v11 = vld [vmem:[#allocation0 + $0x1] ss:$8 sm:$0xf]  }
   0xe   :  { %v43_v12 = vsel %vm42_vm0, %v41_v8, %v40_v10  ;;  %v51_v13 = vsel %vm42_vm0, %v49_v9, %v47_v11 }
   0xf   :  { %52 = vrot.lane.b32.xlu0 %v51_v13, %s70_s0  ;;  %45 = vst.msk [vmem:[%s112_s1] sm:$0xff] %vm44_vm1, %v43_v12  }
  0x81   :  { %v53_v14 = vpop.permute.xlu0 %52  }
  0x82   :  { %55 = vst.msk [vmem:[%s112_s1] sm:$0xff] %vm54_vm2, %v53_v14  }

// kernel: positional_encoding_forward.1
= control target key start
LH: loop header
LB: loop body
LE: loop exit
PB: predicated region body
PF: predicated region fallthrough
CT: control target
= control target key end

     0   :  { %vm14_vm0 = vcmask 523264   ;;  %s44_s0 = inlined_call_operand.vmem [shape: f32[8,64], index: 0, kind: input, shape index: {}]   ;;  %s45_s1 = inlined_call_operand.vmem [shape: f32[8,64], index: 1, kind: input, shape index: {}]   ;;  %s46_s2 = inlined_call_operand.vmem [shape: f32[8,64], index: 2, kind: output, shape index: {}]  }
   0x1   :  { %v11_v0 = vld [vmem:[%s44_s0] sm:$0xff] }
   0x2   :  { %v12_v1 = vld [vmem:[%s45_s1] sm:$0xff] }
   0x3   :  { %v13_v2 = vadd.f32 %v12_v1, %v11_v0 }
   0x5   :  { %15 = vst.msk [vmem:[%s46_s2] sm:$0xff] %vm14_vm0, %v13_v2 }

</bundles_post_ra>
